<compile_context>
chip_gen: v7x
topology: tpu7x:2x2x1
jax: 0.10.0
libtpu: 0.0.40
codegen_flags: <defaults>
</compile_context>

<pallas_src>
import jax
import jax.numpy as jnp
from jax import lax
from jax.experimental import pallas as pl
from jax.experimental.pallas import tpu as pltpu

INPUT_SIZE = 20
HIDDEN1 = 128
HIDDEN2 = 64
NUM_ACTIONS = 3
OUT_PAD = 8                 # output features padded to a full sublane group

_TILE_ALIGN = 256           # multiple of 256 (v6e/v7x MXU M) and 128 (lanes / v5e)
DEFAULT_TILE_B = 4096       # per-step batch tile (review: 4096-16384)


def _round_up(n: int, m: int) -> int:
    return ((n + m - 1) // m) * m


def _mlp_kernel(x_ref, w1_ref, w2_ref, w3_ref, b_ref, oT_ref):
    """One batch tile of the fused 3-layer MLP.

    x_ref  : (TILE_B, INPUT_SIZE)   batch-major input tile (HBM layout, no transpose)
    w1_ref : (HIDDEN1, INPUT_SIZE)  torch-native (out, in) weights
    w2_ref : (HIDDEN2, HIDDEN1)
    w3_ref : (OUT_PAD, HIDDEN2)     rows NUM_ACTIONS.. are zero padding
    b_ref  : (HIDDEN1, 3) float32   column j = bias of layer j+1 (zero padded)
    oT_ref : (OUT_PAD, TILE_B)      float32 output, batch on lanes (lane-dense)
    """
    cdt = w1_ref.dtype                       # MXU operand dtype (bf16 by default)
    x = x_ref[...].astype(cdt)               # dtype cast inside the kernel

    # Layer 1: contract the feature axes of (H1, IN) and (TB, IN) -> (H1, TB).
    # Equivalent to W1 @ x^T; batch ends up on the lane axis.  f32 accumulate.
    h1 = lax.dot_general(w1_ref[...], x, (((1,), (1,)), ((), ())),
                         preferred_element_type=jnp.float32)
    h1 = jnp.maximum(h1 + b_ref[:, 0:1], 0.0)            # bias + ReLU in f32

    # Layer 2: (H2, H1) @ (H1, TB) -> (H2, TB).
    h2 = jnp.dot(w2_ref[...], h1.astype(cdt), preferred_element_type=jnp.float32)
    h2 = jnp.maximum(h2 + b_ref[:HIDDEN2, 1:2], 0.0)

    # Layer 3: (8, H2) @ (H2, TB) -> (8, TB); no activation.
    out = jnp.dot(w3_ref[...], h2.astype(cdt), preferred_element_type=jnp.float32)
    oT_ref[...] = (out + b_ref[:OUT_PAD, 2:3]).astype(oT_ref.dtype)


def _fused_mlp(x, params, tile_b):
    """x: (B, INPUT_SIZE) batch-major.  Returns (OUT_PAD, B) float32."""
    w1, w2, w3, b = params["w1"], params["w2"], params["w3"], params["b"]
    B = x.shape[0]

    # Big, 256-aligned batch tile, but clamped so the grid has >= 2 steps when
    # B allows it (both v7x TensorCores get work via "parallel" semantics).
    tb = _round_up(max(int(tile_b), _TILE_ALIGN), _TILE_ALIGN)
    tb = max(min(tb, _round_up(pl.cdiv(B, 2), _TILE_ALIGN)), _TILE_ALIGN)
    grid = (pl.cdiv(B, tb),)   # ragged tail handled by Pallas partial blocks

    x_bytes = jnp.dtype(x.dtype).itemsize
    w_bytes = jnp.dtype(w1.dtype).itemsize

    # Rough live-VMEM estimate: double-buffered I/O tiles + in-kernel casts +
    # f32 intermediates + resident weights/bias.  Raise the scoped-VMEM limit
    # (v5e default is only 16 MiB) when a large tile would exceed it; stay
    # well below v7x's 64 MiB physical VMEM.
    vmem_est = (2 * tb * INPUT_SIZE * (x_bytes + w_bytes)       # x tiles + cast
                + 2 * tb * OUT_PAD * 4                          # out tiles
                + tb * (HIDDEN1 + HIDDEN2) * (4 + w_bytes)      # h1/h2 f32 + casts
                + 256 * 1024)                                   # weights/bias/slack
    vmem_limit = None
    if vmem_est > 14 * 1024 * 1024:
        vmem_limit = min(_round_up(int(vmem_est * 3 // 2), 1 << 20), 56 * 1024 * 1024)

    weight_bytes = sum(int(a.size) * jnp.dtype(a.dtype).itemsize
                       for a in (w1, w2, w3, b))
    cost = pl.CostEstimate(
        flops=2 * B * (INPUT_SIZE * HIDDEN1
                       + HIDDEN1 * HIDDEN2
                       + HIDDEN2 * OUT_PAD),
        transcendentals=0,
        bytes_accessed=(B * INPUT_SIZE * x_bytes     # x in
                        + B * OUT_PAD * 4            # out (f32)
                        + weight_bytes),             # resident weights/bias
    )

    return pl.pallas_call(
        _mlp_kernel,
        out_shape=jax.ShapeDtypeStruct((OUT_PAD, B), jnp.float32),
        grid=grid,
        in_specs=[
            # Pipelined batch-major x tile (contiguous rows; no host transpose).
            pl.BlockSpec((tb, INPUT_SIZE), lambda i: (i, 0)),
            # Weights / packed bias: constant index maps -> VMEM resident.
            pl.BlockSpec(w1.shape, lambda i: (0, 0)),
            pl.BlockSpec(w2.shape, lambda i: (0, 0)),
            pl.BlockSpec(w3.shape, lambda i: (0, 0)),
            pl.BlockSpec(b.shape, lambda i: (0, 0)),
        ],
        # Lane-dense, full-sublane output tile (batch on lanes).
        out_specs=pl.BlockSpec((OUT_PAD, tb), lambda i: (0, i)),
        compiler_params=pltpu.CompilerParams(
            dimension_semantics=("parallel",),       # shard batch tiles across TCs
            vmem_limit_bytes=vmem_limit,
        ),
        cost_estimate=cost,
    )(x, w1, w2, w3, b)


def advantage_network_forward(x, params, *, tile_b=DEFAULT_TILE_B):
    """AdvantageNetwork forward.  x: (B, INPUT_SIZE) -> (B, NUM_ACTIONS) f32."""
    outT = _fused_mlp(x, params, tile_b)                 # (OUT_PAD, B)
    return jnp.transpose(outT[:NUM_ACTIONS, :])          # (B, NUM_ACTIONS)


def init_params(key, dtype=jnp.bfloat16):
    """torch.nn.Linear default init; weights stored (out, in), bf16 by default.

    Biases stay float32 (added in the f32 accumulator).  W3 is zero-padded to
    OUT_PAD rows so the last matmul/store are full-sublane.
    """
    keys = jax.random.split(key, 6)

    def linear(kw, kb, fan_in, fan_out):
        bound = 1.0 / (fan_in ** 0.5)
        w = jax.random.uniform(kw, (fan_out, fan_in), jnp.float32, -bound, bound)
        bb = jax.random.uniform(kb, (fan_out,), jnp.float32, -bound, bound)
        return w, bb

    w1, b1 = linear(keys[0], keys[1], INPUT_SIZE, HIDDEN1)
    w2, b2 = linear(keys[2], keys[3], HIDDEN1, HIDDEN2)
    w3, b3 = linear(keys[4], keys[5], HIDDEN2, NUM_ACTIONS)

    w3_padded = jnp.zeros((OUT_PAD, HIDDEN2), jnp.float32).at[:NUM_ACTIONS].set(w3)

    # Pack the three bias vectors as zero-padded columns of one (HIDDEN1, 3)
    # f32 array (one resident operand instead of three tiny DMAs).
    # NOTE: layout assumes HIDDEN1 >= HIDDEN2 >= OUT_PAD (true here).
    b_packed = jnp.zeros((HIDDEN1, 3), jnp.float32)
    b_packed = b_packed.at[:, 0].set(b1)
    b_packed = b_packed.at[:HIDDEN2, 1].set(b2)
    b_packed = b_packed.at[:NUM_ACTIONS, 2].set(b3)

    return {"w1": w1.astype(dtype), "w2": w2.astype(dtype),
            "w3": w3_padded.astype(dtype), "b": b_packed}


def cast_params(params, dtype):
    """Cast the MXU operands (weights) to `dtype`; biases stay float32."""
    return {"w1": params["w1"].astype(dtype), "w2": params["w2"].astype(dtype),
            "w3": params["w3"].astype(dtype), "b": params["b"]}


def reference_forward(x, params):
    """Pure-JAX reference (f32 math on the stored weights)."""
    w1 = params["w1"].astype(jnp.float32)
    w2 = params["w2"].astype(jnp.float32)
    w3 = params["w3"].astype(jnp.float32)[:NUM_ACTIONS]
    b = params["b"]
    h1 = jnp.maximum(x @ w1.T + b[:, 0], 0.0)
    h2 = jnp.maximum(h1 @ w2.T + b[:HIDDEN2, 1], 0.0)
    return h2 @ w3.T + b[:NUM_ACTIONS, 2]


if __name__ == "__main__":
    key = jax.random.PRNGKey(0)
    kx, kx2, kp = jax.random.split(key, 3)

    # ---- f32-operand path: tight check against the pure-JAX reference. ----
    params_f32 = init_params(kp, dtype=jnp.float32)

    # Tiny batch: single (partial) grid step, exercises OOB-read / masked-write.
    B = 8
    x = jax.random.normal(kx, (B, INPUT_SIZE), jnp.float32)
    out = jax.block_until_ready(advantage_network_forward(x, params_f32))
    ref = reference_forward(x, params_f32)
    assert out.shape == (B, NUM_ACTIONS)
    assert jnp.allclose(out, ref, atol=1e-4, rtol=1e-4), "f32 mismatch (small batch)"

    # Ragged multi-tile batch: 600 rows, tile_b=256 -> 3 grid steps (last partial).
    B2 = 600
    x2 = jax.random.normal(kx2, (B2, INPUT_SIZE), jnp.float32)
    out2 = jax.block_until_ready(
        advantage_network_forward(x2, params_f32, tile_b=256))
    ref2 = reference_forward(x2, params_f32)
    assert out2.shape == (B2, NUM_ACTIONS)
    assert jnp.allclose(out2, ref2, atol=1e-4, rtol=1e-4), "f32 mismatch (multi-tile)"

    # ---- default bf16-operand path (f32 accumulation / biases). ----
    params_bf16 = init_params(kp)                 # bf16 weights by default
    out_bf = jax.block_until_ready(advantage_network_forward(x2, params_bf16))
    ref_bf = reference_forward(x2, params_bf16)
    assert out_bf.shape == (B2, NUM_ACTIONS)
    assert jnp.allclose(out_bf, ref_bf, atol=7.5e-2, rtol=7.5e-2), "bf16 mismatch"

    print("KERNEL_OK")
</pallas_src>

<mosaic_0001>
module attributes {stable_mosaic.version = 11 : i64} {
  func.func @_mlp_kernel(%arg0: i32, %arg1: memref<256x20xf32, #tpu.memory_space<vmem>>, %arg2: memref<128x20xf32, #tpu.memory_space<vmem>>, %arg3: memref<64x128xf32, #tpu.memory_space<vmem>>, %arg4: memref<8x64xf32, #tpu.memory_space<vmem>>, %arg5: memref<128x3xf32, #tpu.memory_space<vmem>>, %arg6: memref<8x256xf32, #tpu.memory_space<vmem>>) attributes {dimension_semantics = [#tpu.dimension_semantics<parallel>], iteration_bounds = array<i64: 1>, scalar_prefetch = 0 : i64, scratch_operands = 0 : i64, tpu.core_type = #tpu.core_type<tc>, window_params = [{transform_indices = @transform_0, window_bounds = array<i64: 256, 20>}, {pipeline_mode = #tpu.pipeline_mode<synchronous>, transform_indices = @transform_1, window_bounds = array<i64: 128, 20>}, {pipeline_mode = #tpu.pipeline_mode<synchronous>, transform_indices = @transform_2, window_bounds = array<i64: 64, 128>}, {pipeline_mode = #tpu.pipeline_mode<synchronous>, transform_indices = @transform_3, window_bounds = array<i64: 8, 64>}, {pipeline_mode = #tpu.pipeline_mode<synchronous>, transform_indices = @transform_4, window_bounds = array<i64: 128, 3>}, {transform_indices = @transform_5, window_bounds = array<i64: 8, 256>}]} {
    %c0 = arith.constant 0 : index
    %c0_0 = arith.constant 0 : index
    %0 = vector.load %arg1[%c0, %c0_0] : memref<256x20xf32, #tpu.memory_space<vmem>>, vector<256x20xf32>
    %c0_1 = arith.constant 0 : index
    %c0_2 = arith.constant 0 : index
    %1 = vector.load %arg2[%c0_1, %c0_2] : memref<128x20xf32, #tpu.memory_space<vmem>>, vector<128x20xf32>
    %cst = arith.constant dense<0.000000e+00> : vector<128x256xf32>
    %2 = tpu.matmul %1, %0, %cst {dimension_numbers = #tpu.dot_dimension_numbers<[1], [1], [0], [0], [0, 0, 1, 0], [], []>} : vector<128x20xf32>, vector<256x20xf32>, vector<128x256xf32> -> vector<128x256xf32>
    %c0_3 = arith.constant 0 : index
    %c0_4 = arith.constant 0 : index
    %3 = vector.load %arg5[%c0_3, %c0_4] : memref<128x3xf32, #tpu.memory_space<vmem>>, vector<128x1xf32>
    %4 = vector.broadcast %3 : vector<128x1xf32> to vector<128x256xf32>
    %5 = arith.addf %2, %4 : vector<128x256xf32>
    %cst_5 = arith.constant 0.000000e+00 : f32
    %6 = vector.broadcast %cst_5 : f32 to vector<128x256xf32>
    %7 = arith.maximumf %5, %6 : vector<128x256xf32>
    %c0_6 = arith.constant 0 : index
    %c0_7 = arith.constant 0 : index
    %8 = vector.load %arg3[%c0_6, %c0_7] : memref<64x128xf32, #tpu.memory_space<vmem>>, vector<64x128xf32>
    %cst_8 = arith.constant dense<0.000000e+00> : vector<64x256xf32>
    %9 = tpu.matmul %8, %7, %cst_8 {dimension_numbers = #tpu.dot_dimension_numbers<[1], [0], [0], [1], [0, 0, 1, 1], [], []>} : vector<64x128xf32>, vector<128x256xf32>, vector<64x256xf32> -> vector<64x256xf32>
    %c0_9 = arith.constant 0 : index
    %c1 = arith.constant 1 : index
    %10 = vector.load %arg5[%c0_9, %c1] : memref<128x3xf32, #tpu.memory_space<vmem>>, vector<64x1xf32>
    %11 = vector.broadcast %10 : vector<64x1xf32> to vector<64x256xf32>
    %12 = arith.addf %9, %11 : vector<64x256xf32>
    %cst_10 = arith.constant 0.000000e+00 : f32
    %13 = vector.broadcast %cst_10 : f32 to vector<64x256xf32>
    %14 = arith.maximumf %12, %13 : vector<64x256xf32>
    %c0_11 = arith.constant 0 : index
    %c0_12 = arith.constant 0 : index
    %15 = vector.load %arg4[%c0_11, %c0_12] : memref<8x64xf32, #tpu.memory_space<vmem>>, vector<8x64xf32>
    %cst_13 = arith.constant dense<0.000000e+00> : vector<8x256xf32>
    %16 = tpu.matmul %15, %14, %cst_13 {dimension_numbers = #tpu.dot_dimension_numbers<[1], [0], [0], [1], [0, 0, 1, 1], [], []>} : vector<8x64xf32>, vector<64x256xf32>, vector<8x256xf32> -> vector<8x256xf32>
    %c0_14 = arith.constant 0 : index
    %c2 = arith.constant 2 : index
    %17 = vector.load %arg5[%c0_14, %c2] : memref<128x3xf32, #tpu.memory_space<vmem>>, vector<8x1xf32>
    %18 = vector.broadcast %17 : vector<8x1xf32> to vector<8x256xf32>
    %19 = arith.addf %16, %18 : vector<8x256xf32>
    %c0_15 = arith.constant 0 : index
    %c0_16 = arith.constant 0 : index
    %20 = vector.load %arg6[%c0_15, %c0_16] : memref<8x256xf32, #tpu.memory_space<vmem>>, vector<8x256xf32>
    tpu.vector_store %arg6[%c0_15, %c0_16], %19 {strides = array<i32>} : memref<8x256xf32, #tpu.memory_space<vmem>>, vector<8x256xf32>,
    return
  }
  func.func @transform_0(%arg0: i32) -> (i32, i32) {
    %c0_i32 = arith.constant 0 : i32
    %c0_i32_0 = arith.constant 0 : i32
    return %arg0, %c0_i32 : i32, i32
  }
  func.func @transform_1(%arg0: i32) -> (i32, i32) {
    %c0_i32 = arith.constant 0 : i32
    %c0_i32_0 = arith.constant 0 : i32
    %c0_i32_1 = arith.constant 0 : i32
    return %c0_i32, %c0_i32_0 : i32, i32
  }
  func.func @transform_2(%arg0: i32) -> (i32, i32) {
    %c0_i32 = arith.constant 0 : i32
    %c0_i32_0 = arith.constant 0 : i32
    %c0_i32_1 = arith.constant 0 : i32
    return %c0_i32, %c0_i32_0 : i32, i32
  }
  func.func @transform_3(%arg0: i32) -> (i32, i32) {
    %c0_i32 = arith.constant 0 : i32
    %c0_i32_0 = arith.constant 0 : i32
    %c0_i32_1 = arith.constant 0 : i32
    return %c0_i32, %c0_i32_0 : i32, i32
  }
  func.func @transform_4(%arg0: i32) -> (i32, i32) {
    %c0_i32 = arith.constant 0 : i32
    %c0_i32_0 = arith.constant 0 : i32
    %c0_i32_1 = arith.constant 0 : i32
    return %c0_i32, %c0_i32_0 : i32, i32
  }
  func.func @transform_5(%arg0: i32) -> (i32, i32) {
    %c0_i32 = arith.constant 0 : i32
    %c0_i32_0 = arith.constant 0 : i32
    return %c0_i32, %arg0 : i32, i32
  }
}

</mosaic_0001>

<bundles_post_ra>
// kernel: tpu_custom_call.1
= control target key start
LH: loop header
LB: loop body
LE: loop exit
PB: predicated region body
PF: predicated region fallthrough
CT: control target
= control target key end

     0   :  { %10 = vsyncpa [#allocation3], 0  ;;  %vm165_vm0 = vcmask 162816   ;;  %v1030_v6 = vmov 0   ;;  %vm695_vm2 = vcmask 523264   ;;  %s1412_s0 = inlined_call_operand.vmem [shape: f32[8,20], index: 0, kind: input, shape index: {}]   ;;  %s1413_s1 = inlined_call_operand.vmem [shape: f32[128,20], index: 1, kind: input, shape index: {}]   ;;  %s1414_s2 = inlined_call_operand.vmem [shape: f32[64,128], index: 2, kind: input, shape index: {}]   ;;  %s1415_s3 = inlined_call_operand.vmem [shape: f32[8,64], index: 3, kind: input, shape index: {}]   ;;  %s1416_s4 = inlined_call_operand.vmem [shape: f32[128,3], index: 4, kind: input, shape index: {}]   ;;  %s1417_s5 = inlined_call_operand.hbm [shape: f32[8,8], index: 5, kind: output, shape index: {}]  }
   0x1   :  { %v37_v0 = vld [vmem:[%s1412_s0 + $0x80] sm:$0xff]  ;;  %v38_v1 = vld [vmem:[%s1412_s0 + $0x88] sm:$0xff]  ;;  %vm1073_vm1 = vmpackc.low %vm165_vm0, %vm165_vm0  ;;  %1000 = vset.pattern.permute.xlu0 %v1030_v6  ;;  %1001 = vset.pattern.permute.xlu1 %v1030_v6 }
   0x2   :  { %v899_v2 = vpack.c.bf16 %v38_v1, %v37_v0  ;;  %v21_v4 = vld [vmem:[%s1412_s0] sm:$0xff]  ;;  %v22_v5 = vld [vmem:[%s1412_s0 + $0x8] sm:$0xff]  ;;  %v39_v8 = vld [vmem:[%s1412_s0 + $0x90] sm:$0xff] }
   0x3   :  { %v902_v7 = vpack.c.bf16 %v22_v5, %v21_v4  ;;  %v40_v9 = vld [vmem:[%s1412_s0 + $0x98] sm:$0xff]  ;;  %v23_v11 = vld [vmem:[%s1412_s0 + $0x10] sm:$0xff]  ;;  %v41_v13 = vld [vmem:[%s1412_s0 + $0xa0] sm:$0xff] }
   0x4   :  { %901 = vmatprep.subr.msk.bf16.mxu0 %vm1073_vm1, %v899_v2  ;;  %v905_v10 = vpack.c.bf16 %v40_v9, %v39_v8  ;;  %v24_v12 = vld [vmem:[%s1412_s0 + $0x18] sm:$0xff]  ;;  %v42_v14 = vld [vmem:[%s1412_s0 + $0xa8] sm:$0xff]  ;;  %v1110_v17 = vld [vmem:[%s1413_s1] sm:$0xff] }
   0x5   :  { %904 = vmatpush3.bf16.xpose.msk.msra.mxu0 %vm1073_vm1, %v902_v7  ;;  %v908_v15 = vpack.c.bf16 %v24_v12, %v23_v11  ;;  %v911_v16 = vpack.c.bf16 %v42_v14, %v41_v13  ;;  %867 = vmatprep.mubr.msk.f32.mxu0 %vm165_vm0, %v1110_v17  ;;  %v25_v18 = vld [vmem:[%s1412_s0 + $0x20] sm:$0xff]  ;;  %v26_v19 = vld [vmem:[%s1412_s0 + $0x28] sm:$0xff]  ;;  %v43_v20 = vld [vmem:[%s1412_s0 + $0xb0] sm:$0xff] }
   0x6   :  { %907 = vmatprep.subr.msk.bf16.mxu0 %vm1073_vm1, %v905_v10  ;;  %v44_v21 = vld [vmem:[%s1412_s0 + $0xb8] sm:$0xff]  ;;  %v914_v22 = vpack.c.bf16 %v26_v19, %v25_v18  ;;  %v1133_v23 = vld [vmem:[%s1416_s4] sm:$0xff]  ;;  %v1139_v25 = vld [vmem:[%s1416_s4 + $0x10] sm:$0xff]  ;;  %v1031_v18 = vmov 0.0   ;;  %v1032_v19 = vmov 1  }
   0x7   :  { %v917_v24 = vpack.c.bf16 %v44_v21, %v43_v20  ;;  %87 = vperm.xlu0 %1000, %v1133_v23   ;;  %v1144_v26 = vld [vmem:[%s1416_s4 + $0x8] sm:$0xff]  ;;  %97 = vperm.xlu1 %1001, %v1139_v25   ;;  %v1150_v27 = vld [vmem:[%s1416_s4 + $0x18] sm:$0xff]  ;;  %v27_v28 = vld [vmem:[%s1412_s0 + $0x30] sm:$0xff] }
   0x8   :  { %v28_v29 = vld [vmem:[%s1412_s0 + $0x38] sm:$0xff]  ;;  %v45_v30 = vld [vmem:[%s1412_s0 + $0xc0] sm:$0xff]  ;;  %v46_v31 = vld [vmem:[%s1412_s0 + $0xc8] sm:$0xff]  ;;  %623 = vmatprep.mubr.f32.mxu1 %v1031_v18 }
   0x9   :  { %v1173_v32 = vld [vmem:[%s1416_s4 + $0x20] sm:$0xff]  ;;  %v1178_v33 = vld [vmem:[%s1416_s4 + $0x28] sm:$0xff]  ;;  %v920_v34 = vpack.c.bf16 %v28_v29, %v27_v28  ;;  %v923_v35 = vpack.c.bf16 %v46_v31, %v45_v30  ;;  %v1185_v36 = vld [vmem:[%s1416_s4 + $0x30] sm:$0xff] }
   0xa   :  { %v1190_v37 = vld [vmem:[%s1416_s4 + $0x38] sm:$0xff]  ;;  %v29_v38 = vld [vmem:[%s1412_s0 + $0x40] sm:$0xff]  ;;  %v30_v39 = vld [vmem:[%s1412_s0 + $0x48] sm:$0xff] }
   0xb   :  { %92 = vperm.xlu0 %1000, %v1144_v26   ;;  %102 = vperm.xlu1 %1001, %v1150_v27   ;;  %v47_v40 = vld [vmem:[%s1412_s0 + $0xd0] sm:$0xff]  ;;  %v48_v41 = vld [vmem:[%s1412_s0 + $0xd8] sm:$0xff]  ;;  %v77_v42 = vld [vmem:[%s1416_s4 + $0x40] sm:$0xff]  ;;  %v926_v44 = vpack.c.bf16 %v30_v39, %v29_v38 }
   0xc   :  { %v78_v43 = vld [vmem:[%s1416_s4 + $0x48] sm:$0xff]  ;;  %v929_v45 = vpack.c.bf16 %v48_v41, %v47_v40  ;;  %v79_v46 = vld [vmem:[%s1416_s4 + $0x50] sm:$0xff]  ;;  %v80_v47 = vld [vmem:[%s1416_s4 + $0x58] sm:$0xff] }
   0xd   :  { %910 = vmatpush3.bf16.xpose.msk.msra.mxu0 %vm1073_vm1, %v908_v15  ;;  %v31_v48 = vld [vmem:[%s1412_s0 + $0x50] sm:$0xff]  ;;  %v32_v49 = vld [vmem:[%s1412_s0 + $0x58] sm:$0xff]  ;;  %v49_v50 = vld [vmem:[%s1412_s0 + $0xe0] sm:$0xff] }
   0xe   :  { %913 = vmatprep.subr.msk.bf16.mxu0 %vm1073_vm1, %v911_v16  ;;  %v50_v51 = vld [vmem:[%s1412_s0 + $0xe8] sm:$0xff]  ;;  %v81_v52 = vld [vmem:[%s1416_s4 + $0x60] sm:$0xff]  ;;  %v932_v54 = vpack.c.bf16 %v32_v49, %v31_v48  ;;  %v83_v56 = vld [vmem:[%s1416_s4 + $0x70] sm:$0xff] }
   0xf   :  { %107 = vperm.xlu0 %1000, %v1173_v32   ;;  %112 = vperm.xlu1 %1001, %v1178_v33   ;;  %v82_v53 = vld [vmem:[%s1416_s4 + $0x68] sm:$0xff]  ;;  %v935_v55 = vpack.c.bf16 %v50_v51, %v49_v50  ;;  %v84_v57 = vld [vmem:[%s1416_s4 + $0x78] sm:$0xff]  ;;  %v33_v58 = vld [vmem:[%s1412_s0 + $0x60] sm:$0xff] }
  0x10   :  { %v34_v59 = vld [vmem:[%s1412_s0 + $0x68] sm:$0xff]  ;;  %v51_v60 = vld [vmem:[%s1412_s0 + $0xf0] sm:$0xff]  ;;  %v52_v61 = vld [vmem:[%s1412_s0 + $0xf8] sm:$0xff] }
  0x11   :  { %v938_v62 = vpack.c.bf16 %v34_v59, %v33_v58  ;;  %v941_v63 = vpack.c.bf16 %v52_v61, %v51_v60  ;;  %v35_v0 = vld [vmem:[%s1412_s0 + $0x70] sm:$0xff]  ;;  %v36_v1 = vld [vmem:[%s1412_s0 + $0x78] sm:$0xff]  ;;  %v54_v4 = vld [vmem:[%s1413_s1 + $0x8] sm:$0xff] }
  0x12   :  { %v944_v2 = vpack.c.bf16 %v36_v1, %v35_v0  ;;  %v55_v5 = vld [vmem:[%s1413_s1 + $0x10] sm:$0xff]  ;;  %v56_v3 = vld [vmem:[%s1413_s1 + $0x18] sm:$0xff]  ;;  %v57_v6 = vld [vmem:[%s1413_s1 + $0x20] sm:$0xff] }
  0x13   :  { %117 = vperm.xlu0 %1000, %v1185_v36   ;;  %122 = vperm.xlu1 %1001, %v1190_v37   ;;  %v58_v7 = vld [vmem:[%s1413_s1 + $0x28] sm:$0xff]  ;;  %v59_v8 = vld [vmem:[%s1413_s1 + $0x30] sm:$0xff]  ;;  %v60_v9 = vld [vmem:[%s1413_s1 + $0x38] sm:$0xff] }
  0x14   :  { %v61_v10 = vld [vmem:[%s1413_s1 + $0x40] sm:$0xff]  ;;  %v62_v11 = vld [vmem:[%s1413_s1 + $0x48] sm:$0xff]  ;;  %v63_v12 = vld [vmem:[%s1413_s1 + $0x50] sm:$0xff] }
  0x15   :  { %916 = vmatpush3.bf16.xpose.msk.msra.mxu0 %vm1073_vm1, %v914_v22  ;;  %v64_v13 = vld [vmem:[%s1413_s1 + $0x58] sm:$0xff]  ;;  %v65_v14 = vld [vmem:[%s1413_s1 + $0x60] sm:$0xff]  ;;  %v66_v15 = vld [vmem:[%s1413_s1 + $0x68] sm:$0xff] }
  0x16   :  { %919 = vmatprep.subr.msk.bf16.mxu0 %vm1073_vm1, %v917_v24  ;;  %v67_v16 = vld [vmem:[%s1413_s1 + $0x70] sm:$0xff] }
  0x17   :  { %127 = vperm.xlu0 %1000, %v77_v42   ;;  %132 = vperm.xlu1 %1001, %v78_v43  }
  0x1b   :  { %137 = vperm.xlu0 %1000, %v79_v46   ;;  %142 = vperm.xlu1 %1001, %v80_v47  }
  0x1d   :  { %922 = vmatpush3.bf16.xpose.msk.msra.mxu0 %vm1073_vm1, %v920_v34 }
  0x1e   :  { %925 = vmatprep.subr.msk.bf16.mxu0 %vm1073_vm1, %v923_v35 }
  0x1f   :  { %147 = vperm.xlu0 %1000, %v81_v52   ;;  %152 = vperm.xlu1 %1001, %v82_v53  }
  0x23   :  { %157 = vperm.xlu0 %1000, %v83_v56   ;;  %162 = vperm.xlu1 %1001, %v84_v57  }
  0x25   :  { %928 = vmatpush3.bf16.xpose.msk.msra.mxu0 %vm1073_vm1, %v926_v44 }
  0x26   :  { %931 = vmatprep.subr.msk.bf16.mxu0 %vm1073_vm1, %v929_v45 }
  0x27   :  { %1003 = vset.pattern.permute.xlu1 %v1032_v19  ;;  %1002 = vset.pattern.permute.xlu0 %v1032_v19 }
  0x28   :  { %526 = vperm.xlu1 %1003, %v1144_v26   ;;  %521 = vperm.xlu0 %1002, %v1133_v23  }
  0x2c   :  { %531 = vperm.xlu1 %1003, %v1139_v25   ;;  %536 = vperm.xlu0 %1002, %v1150_v27  }
  0x2d   :  { %934 = vmatpush3.bf16.xpose.msk.msra.mxu0 %vm1073_vm1, %v932_v54 }
  0x2e   :  { %937 = vmatprep.subr.msk.bf16.mxu0 %vm1073_vm1, %v935_v55 }
  0x30   :  { %541 = vperm.xlu1 %1003, %v1173_v32   ;;  %546 = vperm.xlu0 %1002, %v1178_v33  }
  0x34   :  { %551 = vperm.xlu1 %1003, %v1185_v36   ;;  %556 = vperm.xlu0 %1002, %v1190_v37  }
  0x35   :  { %940 = vmatpush3.bf16.xpose.msk.msra.mxu0 %vm1073_vm1, %v938_v62 }
  0x36   :  { %943 = vmatprep.subr.msk.bf16.mxu0 %vm1073_vm1, %v941_v63 }
  0x3d   :  { %946 = vmatpush3.bf16.xpose.msk.msra.mxu0 %vm1073_vm1, %v944_v2 }
  0x44   :  { %868 = vmatmul.mubr.msk.f32.vlgmr.msra.gmra.mrb[0].mxu0 %vm165_vm0, %v1110_v17  ;;  %v68_v17 = vld [vmem:[%s1413_s1 + $0x78] sm:$0xff] }
  0x45   :  { %869 = vmatprep.mubr.msk.f32.mxu0 %vm165_vm0, %v54_v4 }
  0x48   :  { %870 = vmatmul.mubr.msk.f32.gmra.mrb[2].mxu0 %vm165_vm0, %v54_v4 }
  0x49   :  { %871 = vmatprep.mubr.msk.f32.mxu0 %vm165_vm0, %v55_v5 }
  0x4c   :  { %872 = vmatmul.mubr.msk.f32.gmra.mrb[4].mxu0 %vm165_vm0, %v55_v5 }
  0x4d   :  { %873 = vmatprep.mubr.msk.f32.mxu0 %vm165_vm0, %v56_v3 }
  0x50   :  { %874 = vmatmul.mubr.msk.f32.gmra.mrb[6].mxu0 %vm165_vm0, %v56_v3 }
  0x51   :  { %875 = vmatprep.mubr.msk.f32.mxu0 %vm165_vm0, %v57_v6 }
  0x54   :  { %876 = vmatmul.mubr.msk.f32.gmra.mrb[8].mxu0 %vm165_vm0, %v57_v6 }
  0x55   :  { %877 = vmatprep.mubr.msk.f32.mxu0 %vm165_vm0, %v58_v7 }
  0x58   :  { %878 = vmatmul.mubr.msk.f32.gmra.mrb[10].mxu0 %vm165_vm0, %v58_v7 }
  0x59   :  { %879 = vmatprep.mubr.msk.f32.mxu0 %vm165_vm0, %v59_v8 }
  0x5c   :  { %880 = vmatmul.mubr.msk.f32.gmra.mrb[12].mxu0 %vm165_vm0, %v59_v8 }
  0x5d   :  { %881 = vmatprep.mubr.msk.f32.mxu0 %vm165_vm0, %v60_v9 }
  0x60   :  { %882 = vmatmul.mubr.msk.f32.gmra.mrb[14].mxu0 %vm165_vm0, %v60_v9 }
  0x61   :  { %883 = vmatprep.mubr.msk.f32.mxu0 %vm165_vm0, %v61_v10 }
  0x64   :  { %884 = vmatmul.mubr.msk.f32.gmra.mrb[16].mxu0 %vm165_vm0, %v61_v10 }
  0x65   :  { %885 = vmatprep.mubr.msk.f32.mxu0 %vm165_vm0, %v62_v11 }
  0x68   :  { %886 = vmatmul.mubr.msk.f32.gmra.mrb[18].mxu0 %vm165_vm0, %v62_v11 }
  0x69   :  { %887 = vmatprep.mubr.msk.f32.mxu0 %vm165_vm0, %v63_v12 }
  0x6c   :  { %888 = vmatmul.mubr.msk.f32.gmra.mrb[20].mxu0 %vm165_vm0, %v63_v12 }
  0x6d   :  { %889 = vmatprep.mubr.msk.f32.mxu0 %vm165_vm0, %v64_v13 }
  0x70   :  { %890 = vmatmul.mubr.msk.f32.gmra.mrb[22].mxu0 %vm165_vm0, %v64_v13 }
  0x71   :  { %891 = vmatprep.mubr.msk.f32.mxu0 %vm165_vm0, %v65_v14 }
  0x74   :  { %892 = vmatmul.mubr.msk.f32.gmra.mrb[24].mxu0 %vm165_vm0, %v65_v14 }
  0x75   :  { %893 = vmatprep.mubr.msk.f32.mxu0 %vm165_vm0, %v66_v15 }
  0x78   :  { %894 = vmatmul.mubr.msk.f32.gmra.mrb[26].mxu0 %vm165_vm0, %v66_v15 }
  0x79   :  { %895 = vmatprep.mubr.msk.f32.mxu0 %vm165_vm0, %v67_v16 }
  0x7c   :  { %896 = vmatmul.mubr.msk.f32.gmra.mrb[28].mxu0 %vm165_vm0, %v67_v16 }
  0x7d   :  { %897 = vmatprep.mubr.msk.f32.mxu0 %vm165_vm0, %v68_v17 }
  0x80   :  { %898 = vmatmul.mubr.msk.f32.gmra.mrb[30].mxu0 %vm165_vm0, %v68_v17 }
  0x86   :  { %v88_v20 = vpop.permute.xlu0 %87  ;;  %v98_v25 = vpop.permute.xlu1 %97 }
  0x8a   :  { %v93_v24 = vpop.permute.xlu0 %92  ;;  %v103_v41 = vpop.permute.xlu1 %102 }
  0x8e   :  { %v108_v54 = vpop.permute.xlu0 %107  ;;  %v113_v57 = vpop.permute.xlu1 %112 }
  0x92   :  { %v118_v6 = vpop.permute.xlu0 %117  ;;  %v123_v9 = vpop.permute.xlu1 %122 }
 0x117   :  { %v376_v21 = vpop.f32.mrb[0].mxu0 }
 0x118   :  { %v378_v22 = vpop.f32.mrb[1].mxu0  ;;  %v377_v28 = vadd.f32 %v376_v21, %v88_v20 }
 0x119   :  { %v379_v26 = vadd.f32 %v378_v22, %v88_v20 }
 0x11a   :  { %v471_v27 = vmax.f32 %v377_v28, 0.0 }
 0x11b   :  { %v382_v29 = vpop.f32.mrb[2].mxu0  ;;  %v472_v32 = vmax.f32 %v379_v26, 0.0 }
 0x11c   :  { %v383_v30 = vadd.f32 %v382_v29, %v93_v24  ;;  %v384_v31 = vpop.f32.mrb[3].mxu0  ;;  %v133_v29 = vpop.permute.xlu1 %132 }
 0x11d   :  { %v385_v34 = vadd.f32 %v384_v31, %v93_v24  ;;  %v128_v24 = vpop.permute.xlu0 %127 }
 0x11e   :  { %v473_v35 = vmax.f32 %v383_v30, 0.0 }
 0x11f   :  { %v474_v38 = vmax.f32 %v385_v34, 0.0  ;;  %v388_v33 = vpop.f32.mrb[4].mxu0 }
 0x120   :  { %v390_v39 = vpop.f32.mrb[5].mxu0  ;;  %v949_v36 = vpack.c.bf16 %v473_v35, %v471_v27  ;;  %v389_v37 = vadd.f32 %v388_v33, %v98_v25 }
 0x121   :  { %v947_v40 = vpack.c.bf16 %v474_v38, %v472_v32  ;;  %v391_v42 = vadd.f32 %v390_v39, %v98_v25 }
 0x122   :  { %v475_v47 = vmax.f32 %v389_v37, 0.0  ;;  %v138_v37 = vpop.permute.xlu0 %137 }
 0x123   :  { %v394_v43 = vpop.f32.mrb[6].mxu0  ;;  %948 = vmatprep.subr.bf16.mxu1 %v947_v40  ;;  %v476_v49 = vmax.f32 %v391_v42, 0.0 }
 0x124   :  { %v395_v44 = vadd.f32 %v394_v43, %v103_v41  ;;  %v396_v45 = vpop.f32.mrb[7].mxu0  ;;  %950 = vmatpush1.bf16.msra.mxu1 %v949_v36  ;;  %v143_v43 = vpop.permute.xlu1 %142 }
 0x125   :  { %v397_v46 = vadd.f32 %v396_v45, %v103_v41 }
 0x126   :  { %v477_v48 = vmax.f32 %v395_v44, 0.0 }
 0x127   :  { %v478_v50 = vmax.f32 %v397_v46, 0.0  ;;  %v400_v51 = vpop.f32.mrb[8].mxu0 }
 0x128   :  { %v953_v52 = vpack.c.bf16 %v477_v48, %v475_v47  ;;  %v402_v53 = vpop.f32.mrb[9].mxu0  ;;  %v401_v56 = vadd.f32 %v400_v51, %v108_v54 }
 0x129   :  { %v951_v55 = vpack.c.bf16 %v478_v50, %v476_v49  ;;  %v403_v58 = vadd.f32 %v402_v53, %v108_v54 }
 0x12a   :  { %v479_v63 = vmax.f32 %v401_v56, 0.0  ;;  %v148_v56 = vpop.permute.xlu0 %147 }
 0x12b   :  { %v406_v59 = vpop.f32.mrb[10].mxu0  ;;  %952 = vmatprep.subr.bf16.mxu1 %v951_v55  ;;  %v480_v1 = vmax.f32 %v403_v58, 0.0 }
 0x12c   :  { %v407_v60 = vadd.f32 %v406_v59, %v113_v57  ;;  %v408_v61 = vpop.f32.mrb[11].mxu0  ;;  %954 = vmatpush1.bf16.msra.mxu1 %v953_v52  ;;  %v153_v59 = vpop.permute.xlu1 %152 }
 0x12d   :  { %v409_v62 = vadd.f32 %v408_v61, %v113_v57 }
 0x12e   :  { %v481_v0 = vmax.f32 %v407_v60, 0.0 }
 0x12f   :  { %v482_v2 = vmax.f32 %v409_v62, 0.0  ;;  %v412_v4 = vpop.f32.mrb[12].mxu0 }
 0x130   :  { %v957_v5 = vpack.c.bf16 %v481_v0, %v479_v63  ;;  %v414_v3 = vpop.f32.mrb[13].mxu0  ;;  %v413_v8 = vadd.f32 %v412_v4, %v118_v6 }
 0x131   :  { %v955_v7 = vpack.c.bf16 %v482_v2, %v480_v1  ;;  %v415_v10 = vadd.f32 %v414_v3, %v118_v6 }
 0x132   :  { %v483_v15 = vmax.f32 %v413_v8, 0.0  ;;  %v158_v8 = vpop.permute.xlu0 %157 }
 0x133   :  { %v418_v11 = vpop.f32.mrb[14].mxu0  ;;  %956 = vmatprep.subr.bf16.mxu1 %v955_v7  ;;  %v484_v17 = vmax.f32 %v415_v10, 0.0 }
 0x134   :  { %v419_v12 = vadd.f32 %v418_v11, %v123_v9  ;;  %v420_v13 = vpop.f32.mrb[15].mxu0  ;;  %958 = vmatpush1.bf16.msra.mxu1 %v957_v5  ;;  %v163_v11 = vpop.permute.xlu1 %162 }
 0x135   :  { %v421_v14 = vadd.f32 %v420_v13, %v123_v9 }
 0x136   :  { %v485_v16 = vmax.f32 %v419_v12, 0.0 }
 0x137   :  { %v486_v19 = vmax.f32 %v421_v14, 0.0  ;;  %v424_v20 = vpop.f32.mrb[16].mxu0 }
 0x138   :  { %v961_v21 = vpack.c.bf16 %v485_v16, %v483_v15  ;;  %v426_v22 = vpop.f32.mrb[17].mxu0  ;;  %v425_v26 = vadd.f32 %v424_v20, %v128_v24 }
 0x139   :  { %v959_v28 = vpack.c.bf16 %v486_v19, %v484_v17  ;;  %v427_v30 = vadd.f32 %v426_v22, %v128_v24 }
 0x13a   :  { %v487_v35 = vmax.f32 %v425_v26, 0.0  ;;  %v504_v26 = vld [vmem:[%s1414_s2 + $0x8] sm:$0xff] }
 0x13b   :  { %v430_v31 = vpop.f32.mrb[18].mxu0  ;;  %960 = vmatprep.subr.bf16.mxu1 %v959_v28  ;;  %v488_v38 = vmax.f32 %v427_v30, 0.0  ;;  %v503_v28 = vld [vmem:[%s1414_s2] sm:$0xff]  ;;  %v506_v30 = vld [vmem:[%s1414_s2 + $0x18] sm:$0xff] }
 0x13c   :  { %v431_v25 = vadd.f32 %v430_v31, %v133_v29  ;;  %v432_v34 = vpop.f32.mrb[19].mxu0  ;;  %962 = vmatpush1.bf16.msra.mxu1 %v961_v21  ;;  %v507_v31 = vld [vmem:[%s1414_s2 + $0x20] sm:$0xff] }
 0x13d   :  { %v433_v27 = vadd.f32 %v432_v34, %v133_v29  ;;  %v505_v29 = vld [vmem:[%s1414_s2 + $0x10] sm:$0xff] }
 0x13e   :  { %v489_v32 = vmax.f32 %v431_v25, 0.0  ;;  %v508_v25 = vld [vmem:[%s1414_s2 + $0x28] sm:$0xff]  ;;  %v509_v34 = vld [vmem:[%s1414_s2 + $0x30] sm:$0xff] }
 0x13f   :  { %v490_v33 = vmax.f32 %v433_v27, 0.0  ;;  %v436_v39 = vpop.f32.mrb[20].mxu0  ;;  %v510_v27 = vld [vmem:[%s1414_s2 + $0x38] sm:$0xff] }
 0x140   :  { %v965_v36 = vpack.c.bf16 %v489_v32, %v487_v35  ;;  %v438_v40 = vpop.f32.mrb[21].mxu0  ;;  %v437_v42 = vadd.f32 %v436_v39, %v138_v37  ;;  %v1033_v35 = vmov 2   ;;  %v522_v32 = vpop.permute.xlu0 %521 }
 0x141   :  { %v963_v41 = vpack.c.bf16 %v490_v33, %v488_v38  ;;  %v439_v44 = vadd.f32 %v438_v40, %v138_v37  ;;  %1004 = vset.pattern.permute.xlu1 %v1033_v35  ;;  %1005 = vset.pattern.permute.xlu0 %v1033_v35  ;;  %v527_v39 = vpop.permute.xlu1 %526 }
 0x142   :  { %v491_v49 = vmax.f32 %v437_v42, 0.0  ;;  %692 = vperm.xlu1 %1004, %v1133_v23  }
 0x143   :  { %v442_v45 = vpop.f32.mrb[22].mxu0  ;;  %964 = vmatprep.subr.bf16.mxu1 %v963_v41  ;;  %v492_v51 = vmax.f32 %v439_v44, 0.0 }
 0x144   :  { %v443_v46 = vadd.f32 %v442_v45, %v143_v43  ;;  %v444_v47 = vpop.f32.mrb[23].mxu0  ;;  %966 = vmatpush1.bf16.msra.mxu1 %v965_v36 }
 0x145   :  { %v445_v48 = vadd.f32 %v444_v47, %v143_v43 }
 0x146   :  { %v493_v50 = vmax.f32 %v443_v46, 0.0  ;;  %v532_v46 = vpop.permute.xlu1 %531 }
 0x147   :  { %v494_v52 = vmax.f32 %v445_v48, 0.0  ;;  %v448_v53 = vpop.f32.mrb[24].mxu0 }
 0x148   :  { %v969_v54 = vpack.c.bf16 %v493_v50, %v491_v49  ;;  %v450_v55 = vpop.f32.mrb[25].mxu0  ;;  %v449_v58 = vadd.f32 %v448_v53, %v148_v56 }
 0x149   :  { %v967_v57 = vpack.c.bf16 %v494_v52, %v492_v51  ;;  %v451_v60 = vadd.f32 %v450_v55, %v148_v56  ;;  %v537_v52 = vpop.permute.xlu0 %536 }
 0x14a   :  { %v495_v1 = vmax.f32 %v449_v58, 0.0 }
 0x14b   :  { %v454_v61 = vpop.f32.mrb[26].mxu0  ;;  %968 = vmatprep.subr.bf16.mxu1 %v967_v57  ;;  %v496_v4 = vmax.f32 %v451_v60, 0.0 }
 0x14c   :  { %v455_v62 = vadd.f32 %v454_v61, %v153_v59  ;;  %v456_v63 = vpop.f32.mrb[27].mxu0  ;;  %970 = vmatpush1.bf16.msra.mxu1 %v969_v54 }
 0x14d   :  { %v457_v0 = vadd.f32 %v456_v63, %v153_v59 }
 0x14e   :  { %v497_v2 = vmax.f32 %v455_v62, 0.0 }
 0x14f   :  { %v498_v5 = vmax.f32 %v457_v0, 0.0  ;;  %v460_v3 = vpop.f32.mrb[28].mxu0 }
 0x150   :  { %v973_v6 = vpack.c.bf16 %v497_v2, %v495_v1  ;;  %v462_v7 = vpop.f32.mrb[29].mxu0  ;;  %v461_v10 = vadd.f32 %v460_v3, %v158_v8  ;;  %v542_v1 = vpop.permute.xlu1 %541 }
 0x151   :  { %v971_v9 = vpack.c.bf16 %v498_v5, %v496_v4  ;;  %v463_v12 = vadd.f32 %v462_v7, %v158_v8  ;;  %v547_v5 = vpop.permute.xlu0 %546 }
 0x152   :  { %v499_v17 = vmax.f32 %v461_v10, 0.0 }
 0x153   :  { %v466_v13 = vpop.f32.mrb[30].mxu0  ;;  %972 = vmatprep.subr.bf16.mxu1 %v971_v9  ;;  %v500_v20 = vmax.f32 %v463_v12, 0.0 }
 0x154   :  { %v467_v14 = vadd.f32 %v466_v13, %v163_v11  ;;  %v468_v15 = vpop.f32.mrb[31].mxu0  ;;  %974 = vmatpush1.bf16.msra.mxu1 %v973_v6 }
 0x155   :  { %v469_v16 = vadd.f32 %v468_v15, %v163_v11 }
 0x156   :  { %v501_v19 = vmax.f32 %v467_v14, 0.0 }
 0x157   :  { %v502_v21 = vmax.f32 %v469_v16, 0.0 }
 0x158   :  { %v977_v22 = vpack.c.bf16 %v501_v19, %v499_v17  ;;  %v552_v17 = vpop.permute.xlu1 %551 }
 0x159   :  { %v975_v24 = vpack.c.bf16 %v502_v21, %v500_v20  ;;  %v557_v21 = vpop.permute.xlu0 %556 }
 0x15b   :  { %976 = vmatprep.subr.bf16.mxu1 %v975_v24 }
 0x15c   :  { %978 = vmatpush1.bf16.msra.mxu1 %v977_v22 }
 0x15f   :  { %624 = vmatmul.mubr.f32.vlgmr.msra.gmra.mrb[0].mxu1 %v503_v28 }
 0x160   :  { %629 = vmatprep.mubr.f32.mxu1 %v1031_v18 }
 0x163   :  { %630 = vmatmul.mubr.f32.gmra.mrb[2].mxu1 %v504_v26 }
 0x164   :  { %635 = vmatprep.mubr.f32.mxu1 %v1031_v18 }
 0x167   :  { %636 = vmatmul.mubr.f32.gmra.mrb[4].mxu1 %v505_v29 }
 0x168   :  { %641 = vmatprep.mubr.f32.mxu1 %v1031_v18 }
 0x16b   :  { %642 = vmatmul.mubr.f32.gmra.mrb[6].mxu1 %v506_v30 }
 0x16c   :  { %647 = vmatprep.mubr.f32.mxu1 %v1031_v18 }
 0x16f   :  { %648 = vmatmul.mubr.f32.gmra.mrb[8].mxu1 %v507_v31 }
 0x170   :  { %653 = vmatprep.mubr.f32.mxu1 %v1031_v18 }
 0x173   :  { %654 = vmatmul.mubr.f32.gmra.mrb[10].mxu1 %v508_v25 }
 0x174   :  { %659 = vmatprep.mubr.f32.mxu1 %v1031_v18 }
 0x177   :  { %660 = vmatmul.mubr.f32.gmra.mrb[12].mxu1 %v509_v34 }
 0x178   :  { %665 = vmatprep.mubr.f32.mxu1 %v1031_v18 }
 0x17b   :  { %666 = vmatmul.mubr.f32.gmra.mrb[14].mxu1 %v510_v27 }
 0x17c   :  { %763 = vmatprep.mubr.f32.mxu1 %v1031_v18 }
 0x232   :  { %v625_v38 = vpop.f32.mrb[0].mxu1 }
 0x233   :  { %v627_v33 = vpop.f32.mrb[1].mxu1  ;;  %v626_v36 = vadd.f32 %v625_v38, %v522_v32  ;;  %v693_v38 = vpop.permute.xlu1 %692 }
 0x234   :  { %v628_v40 = vadd.f32 %v627_v33, %v522_v32  ;;  %v688_v32 = vld [vmem:[%s1415_s3] sm:$0xff] }
 0x235   :  { %v672_v44 = vmax.f32 %v626_v36, 0.0 }
 0x236   :  { %v631_v37 = vpop.f32.mrb[2].mxu1  ;;  %v673_v47 = vmax.f32 %v628_v40, 0.0 }
 0x237   :  { %v632_v41 = vadd.f32 %v631_v37, %v527_v39  ;;  %v633_v42 = vpop.f32.mrb[3].mxu1 }
 0x238   :  { %v634_v43 = vadd.f32 %v633_v42, %v527_v39 }
 0x239   :  { %v674_v45 = vmax.f32 %v632_v41, 0.0 }
 0x23a   :  { %v675_v18 = vmax.f32 %v634_v43, 0.0  ;;  %v637_v48 = vpop.f32.mrb[4].mxu1 }
 0x23b   :  { %v981_v49 = vpack.c.bf16 %v674_v45, %v672_v44  ;;  %v639_v50 = vpop.f32.mrb[5].mxu1  ;;  %v638_v23 = vadd.f32 %v637_v48, %v532_v46 }
 0x23c   :  { %v979_v51 = vpack.c.bf16 %v675_v18, %v673_v47  ;;  %v640_v53 = vadd.f32 %v639_v50, %v532_v46 }
 0x23d   :  { %v676_v58 = vmax.f32 %v638_v23, 0.0 }
 0x23e   :  { %v643_v54 = vpop.f32.mrb[6].mxu1  ;;  %980 = vmatprep.subr.bf16.mxu1 %v979_v51  ;;  %v677_v60 = vmax.f32 %v640_v53, 0.0 }
 0x23f   :  { %v644_v55 = vadd.f32 %v643_v54, %v537_v52  ;;  %v645_v56 = vpop.f32.mrb[7].mxu1  ;;  %982 = vmatpush1.bf16.msra.mxu1 %v981_v49 }
 0x240   :  { %v646_v57 = vadd.f32 %v645_v56, %v537_v52 }
 0x241   :  { %v678_v59 = vmax.f32 %v644_v55, 0.0 }
 0x242   :  { %v679_v61 = vmax.f32 %v646_v57, 0.0  ;;  %v649_v62 = vpop.f32.mrb[8].mxu1 }
 0x243   :  { %v985_v63 = vpack.c.bf16 %v678_v59, %v676_v58  ;;  %v651_v0 = vpop.f32.mrb[9].mxu1  ;;  %v650_v4 = vadd.f32 %v649_v62, %v542_v1 }
 0x244   :  { %v983_v2 = vpack.c.bf16 %v679_v61, %v677_v60  ;;  %v652_v3 = vadd.f32 %v651_v0, %v542_v1 }
 0x245   :  { %v680_v10 = vmax.f32 %v650_v4, 0.0 }
 0x246   :  { %v655_v6 = vpop.f32.mrb[10].mxu1  ;;  %984 = vmatprep.subr.bf16.mxu1 %v983_v2  ;;  %v681_v12 = vmax.f32 %v652_v3, 0.0 }
 0x247   :  { %v656_v7 = vadd.f32 %v655_v6, %v547_v5  ;;  %v657_v8 = vpop.f32.mrb[11].mxu1  ;;  %986 = vmatpush1.bf16.msra.mxu1 %v985_v63 }
 0x248   :  { %v658_v9 = vadd.f32 %v657_v8, %v547_v5 }
 0x249   :  { %v682_v11 = vmax.f32 %v656_v7, 0.0 }
 0x24a   :  { %v683_v13 = vmax.f32 %v658_v9, 0.0  ;;  %v661_v14 = vpop.f32.mrb[12].mxu1 }
 0x24b   :  { %v989_v15 = vpack.c.bf16 %v682_v11, %v680_v10  ;;  %v663_v16 = vpop.f32.mrb[13].mxu1  ;;  %v662_v20 = vadd.f32 %v661_v14, %v552_v17 }
 0x24c   :  { %v987_v19 = vpack.c.bf16 %v683_v13, %v681_v12  ;;  %v664_v22 = vadd.f32 %v663_v16, %v552_v17 }
 0x24d   :  { %v684_v30 = vmax.f32 %v662_v20, 0.0 }
 0x24e   :  { %v667_v24 = vpop.f32.mrb[14].mxu1  ;;  %988 = vmatprep.subr.bf16.mxu1 %v987_v19  ;;  %v685_v25 = vmax.f32 %v664_v22, 0.0 }
 0x24f   :  { %v668_v28 = vadd.f32 %v667_v24, %v557_v21  ;;  %v669_v26 = vpop.f32.mrb[15].mxu1  ;;  %990 = vmatpush1.bf16.msra.mxu1 %v989_v15 }
 0x250   :  { %v670_v29 = vadd.f32 %v669_v26, %v557_v21 }
 0x251   :  { %v686_v31 = vmax.f32 %v668_v28, 0.0 }
 0x252   :  { %v687_v34 = vmax.f32 %v670_v29, 0.0 }
 0x253   :  { %v993_v27 = vpack.c.bf16 %v686_v31, %v684_v30 }
 0x254   :  { %v991_v35 = vpack.c.bf16 %v687_v34, %v685_v25 }
 0x256   :  { %992 = vmatprep.subr.bf16.mxu1 %v991_v35 }
 0x257   :  { %994 = vmatpush1.bf16.msra.mxu1 %v993_v27 }
 0x25a   :  { %834 = vmatmul.mubr.msk.f32.vlgmr.msra.gmra.mrb[16].mxu1 %vm695_vm2, %v688_v32 }
 0x32d   :  { %v765_v33 = vpop.f32.mrb[16].mxu1 }
 0x32e   :  { %v766_v39 = vadd.f32 %v765_v33, %v693_v38  ;;  %v767_v36 = vpop.f32.mrb[17].mxu1 }
 0x32f   :  { %v768_v40 = vadd.f32 %v767_v36, %v693_v38 }
 0x330   :  { %770 = vst [vmem:[#allocation2] sm:$0xff] %v766_v39 }
 0x331   :  { %771 = vst [vmem:[#allocation2 + $0x8] sm:$0xff] %v768_v40 }
 0x332   :  { %776 = vsyncadd [#allocation3], 128  ;;  %s1034_s8 = smov [#allocation2]  }
 0x333   :  { %s778_s9 = sshll.u32 %s1034_s8, 4  ;;  %s779_s9 = int_to_ptr.vmem [resolvable:$true] %s778_s9 }
 0x334   :  { %s1006_s4 = scalar_lea.vmem %s779_s9, 128  ;;  %s1010_s10 = scalar_lea.vmem %s779_s9, 256 }
 0x335   :  { %p1007_p0 = scmp.ne.s32.totalorder %s779_s9, %s1006_s4  ;;  %p1011_p1 = scmp.lt.s32.totalorder %s779_s9, %s779_s9 }
 0x336   :  { %p1012_p2 = scmp.lt.s32.totalorder %s1010_s10, %s1006_s4 }
 0x338   :  { %p1013_p3 = por %p1012_p2, %p1011_p1 }
 0x33a   :  { %p1014_p4 = pnand %p1013_p3, %p1007_p0 }
 0x33c   :  { %1017 = shalt.err (!%p1014_p4)
}
 0x33d   :  { %s1018_s12 = scalar_lea.hbm %s1417_s5, 128 }
 0x33e   :  { %p1019_p5 = scmp.ne.s32.totalorder %s1417_s5, %s1018_s12  ;;  %p1022_p6 = scmp.lt.u32.totalorder %s1018_s12, %s1417_s5 }
 0x340   :  { %p1024_p7 = pnand %p1022_p6, %p1019_p5 }
 0x342   :  { %1027 = shalt.err (!%p1024_p7)
}
 0x343   :  { %781 = dma.vmem_to_hbm [thread:$0]  %s779_s9, 128, %s1417_s5, [#allocation3]  }
 0x344   :  { %1028 = dma.done.wait [#allocation3], 256  }
 0x345   :  { %1029 = vsyncadd [#allocation3], 4294967040 }
 0x346   :  { %785 = vsyncpa [#allocation3], 1 }

</bundles_post_ra>
